<compile_context>
chip_gen: v7x
topology: tpu7x:2x2x1
jax: 0.10.0
libtpu: 0.0.40
codegen_flags: <defaults>
</compile_context>

<pallas_src>
import jax
import jax.numpy as jnp
from jax.experimental import pallas as pl
from jax.experimental.pallas import tpu as pltpu

EPS = 1e-5
LANE = 128


def autoencoder_kernel(x_ref,
                       w_e1_ref, g_e1_ref, bt_e1_ref,
                       w_e2_ref, g_e2_ref, bt_e2_ref,
                       w_e3_ref, b_e3_ref,
                       w_d1_ref, g_d1_ref, bt_d1_ref,
                       w_d2_ref, g_d2_ref, bt_d2_ref,
                       w_d3_ref, g_d3_ref, bt_d3_ref,
                       o_ref):
    f32 = jnp.float32

    def mm(h, w_ref):
        # bf16-stored weights upcast in VMEM; f32 accumulation on the MXU.
        return jnp.dot(h, w_ref[...].astype(f32), preferred_element_type=f32)

    def bn(h, g_ref, bt_ref, *, relu):
        # Training-mode BatchNorm1d as a per-feature scale/shift:
        # one reduction read of h, two full-[B,N] VPU passes (mul, add).
        inv_n = 1.0 / h.shape[0]
        mean = jnp.sum(h, axis=0, keepdims=True) * inv_n
        ex2 = jnp.sum(h * h, axis=0, keepdims=True) * inv_n
        var = jnp.maximum(ex2 - mean * mean, 0.0)       # guard fp cancellation
        scale = g_ref[...] * jax.lax.rsqrt(var + EPS)
        shift = bt_ref[...] - mean * scale
        out = h * scale + shift
        return jnp.maximum(out, 0.0) if relu else out

    x = x_ref[...]

    # ---- Encoder ----
    h = bn(mm(x, w_e1_ref), g_e1_ref, bt_e1_ref, relu=True)
    h = bn(mm(h, w_e2_ref), g_e2_ref, bt_e2_ref, relu=True)
    z = mm(h, w_e3_ref) + b_e3_ref[...]

    # ---- Decoder ----
    h = bn(mm(z, w_d1_ref), g_d1_ref, bt_d1_ref, relu=True)
    h = bn(mm(h, w_d2_ref), g_d2_ref, bt_d2_ref, relu=True)
    h = bn(mm(h, w_d3_ref), g_d3_ref, bt_d3_ref, relu=False)

    o_ref[...] = h.astype(o_ref.dtype)


def _pad_to(n, m):
    return pl.cdiv(n, m) * m


@jax.jit
def autoencoder_forward(x, params):
    B, in_dim = x.shape
    out_dim = params["g_d3"].shape[1]

    in_pad = _pad_to(in_dim, LANE)      # 784 -> 896: lane-dense first-layer loads
    out_pad = _pad_to(out_dim, LANE)    # 784 -> 896: lane-dense final store

    # Zero-pad input columns and the matching w_e1 rows (matmul unchanged).
    x_p = jnp.pad(x, ((0, 0), (0, in_pad - in_dim)))
    w_e1 = jnp.pad(params["w_e1"], ((0, in_pad - in_dim), (0, 0)))

    # Zero-pad output columns of the last layer; sliced off after the kernel.
    w_d3 = jnp.pad(params["w_d3"], ((0, 0), (0, out_pad - out_dim)))
    g_d3 = jnp.pad(params["g_d3"], ((0, 0), (0, out_pad - out_dim)))
    bt_d3 = jnp.pad(params["bt_d3"], ((0, 0), (0, out_pad - out_dim)))

    args = (x_p,
            w_e1, params["g_e1"], params["bt_e1"],
            params["w_e2"], params["g_e2"], params["bt_e2"],
            params["w_e3"], params["b_e3"],
            params["w_d1"], params["g_d1"], params["bt_d1"],
            params["w_d2"], params["g_d2"], params["bt_d2"],
            w_d3, g_d3, bt_d3)

    # Whole-array VMEM operands: everything (<1 MiB total) is resident, which
    # training-mode BN needs anyway. Single invocation, no grid.
    vmem_spec = pl.BlockSpec(memory_space=pltpu.MemorySpace.VMEM)
    out = pl.pallas_call(
        autoencoder_kernel,
        in_specs=[vmem_spec] * len(args),
        out_specs=vmem_spec,
        out_shape=jax.ShapeDtypeStruct((B, out_pad), jnp.float32),
    )(*args)
    return out[:, :out_dim]


def init_params(key, in_dim, hidden, latent, out_dim):
    ks = jax.random.split(key, 7)

    def lin_w(k, fan_in, fan_out):
        bound = 1.0 / (fan_in ** 0.5)
        w = jax.random.uniform(k, (fan_in, fan_out), jnp.float32, -bound, bound)
        return w.astype(jnp.bfloat16)   # bf16 storage halves HBM weight traffic

    def bn_params(n):
        return jnp.ones((1, n), jnp.float32), jnp.zeros((1, n), jnp.float32)

    w_e1 = lin_w(ks[0], in_dim, hidden);  g_e1, bt_e1 = bn_params(hidden)
    w_e2 = lin_w(ks[1], hidden, hidden);  g_e2, bt_e2 = bn_params(hidden)
    w_e3 = lin_w(ks[2], hidden, latent)
    b_bound = 1.0 / (hidden ** 0.5)
    b_e3 = jax.random.uniform(ks[3], (1, latent), jnp.float32, -b_bound, b_bound)

    w_d1 = lin_w(ks[4], latent, hidden);  g_d1, bt_d1 = bn_params(hidden)
    w_d2 = lin_w(ks[5], hidden, hidden);  g_d2, bt_d2 = bn_params(hidden)
    w_d3 = lin_w(ks[6], hidden, out_dim); g_d3, bt_d3 = bn_params(out_dim)

    # Note: linear biases for BN-followed layers are intentionally not
    # instantiated — training-mode BN subtracts them back out exactly.
    return dict(w_e1=w_e1, g_e1=g_e1, bt_e1=bt_e1,
                w_e2=w_e2, g_e2=g_e2, bt_e2=bt_e2,
                w_e3=w_e3, b_e3=b_e3,
                w_d1=w_d1, g_d1=g_d1, bt_d1=bt_d1,
                w_d2=w_d2, g_d2=g_d2, bt_d2=bt_d2,
                w_d3=w_d3, g_d3=g_d3, bt_d3=bt_d3)


def _bn_ref(h, gamma, beta):
    # PyTorch-style two-pass training BN (reference path only).
    mean = jnp.mean(h, axis=0, keepdims=True)
    var = jnp.mean((h - mean) ** 2, axis=0, keepdims=True)
    return (h - mean) * jax.lax.rsqrt(var + EPS) * gamma + beta


def reference_forward(x, p):
    def mm(h, w):
        return h @ w.astype(jnp.float32)

    h = jnp.maximum(_bn_ref(mm(x, p["w_e1"]), p["g_e1"], p["bt_e1"]), 0.0)
    h = jnp.maximum(_bn_ref(mm(h, p["w_e2"]), p["g_e2"], p["bt_e2"]), 0.0)
    z = mm(h, p["w_e3"]) + p["b_e3"]
    h = jnp.maximum(_bn_ref(mm(z, p["w_d1"]), p["g_d1"], p["bt_d1"]), 0.0)
    h = jnp.maximum(_bn_ref(mm(h, p["w_d2"]), p["g_d2"], p["bt_d2"]), 0.0)
    return _bn_ref(mm(h, p["w_d3"]), p["g_d3"], p["bt_d3"])


if __name__ == "__main__":
    # MNIST-flattened autoencoder shapes: input/output 28*28, hidden 32, latent 20.
    B, IN_DIM, HIDDEN, LATENT = 8, 28 * 28, 32, 20

    key = jax.random.PRNGKey(0)
    k_x, k_p = jax.random.split(key)
    x = jax.random.normal(k_x, (B, IN_DIM), jnp.float32)
    params = init_params(k_p, IN_DIM, HIDDEN, LATENT, IN_DIM)

    out = jax.block_until_ready(autoencoder_forward(x, params))
    ref = reference_forward(x, params)

    assert out.shape == (B, IN_DIM)
    err = float(jnp.max(jnp.abs(out - ref)))
    assert jnp.allclose(out, ref, atol=1e-3, rtol=1e-3), err
    print("KERNEL_OK")
</pallas_src>

<mosaic_0001>
module attributes {stable_mosaic.version = 11 : i64} {
  func.func @autoencoder_kernel(%arg0: memref<8x896xf32, #tpu.memory_space<vmem>>, %arg1: memref<896x32xbf16, #tpu.memory_space<vmem>>, %arg2: memref<1x32xf32, #tpu.memory_space<vmem>>, %arg3: memref<1x32xf32, #tpu.memory_space<vmem>>, %arg4: memref<32x32xbf16, #tpu.memory_space<vmem>>, %arg5: memref<1x32xf32, #tpu.memory_space<vmem>>, %arg6: memref<1x32xf32, #tpu.memory_space<vmem>>, %arg7: memref<32x20xbf16, #tpu.memory_space<vmem>>, %arg8: memref<1x20xf32, #tpu.memory_space<vmem>>, %arg9: memref<20x32xbf16, #tpu.memory_space<vmem>>, %arg10: memref<1x32xf32, #tpu.memory_space<vmem>>, %arg11: memref<1x32xf32, #tpu.memory_space<vmem>>, %arg12: memref<32x32xbf16, #tpu.memory_space<vmem>>, %arg13: memref<1x32xf32, #tpu.memory_space<vmem>>, %arg14: memref<1x32xf32, #tpu.memory_space<vmem>>, %arg15: memref<32x896xbf16, #tpu.memory_space<vmem>>, %arg16: memref<1x896xf32, #tpu.memory_space<vmem>>, %arg17: memref<1x896xf32, #tpu.memory_space<vmem>>, %arg18: memref<8x896xf32, #tpu.memory_space<vmem>>) attributes {dimension_semantics = [], scalar_prefetch = 0 : i64, scratch_operands = 0 : i64, tpu.core_type = #tpu.core_type<tc>} {
    %c0 = arith.constant 0 : index
    %c0_0 = arith.constant 0 : index
    %0 = vector.load %arg0[%c0, %c0_0] : memref<8x896xf32, #tpu.memory_space<vmem>>, vector<8x896xf32>
    %c0_1 = arith.constant 0 : index
    %c0_2 = arith.constant 0 : index
    %1 = vector.load %arg1[%c0_1, %c0_2] : memref<896x32xbf16, #tpu.memory_space<vmem>>, vector<896x32xbf16>
    %2 = arith.extf %1 : vector<896x32xbf16> to vector<896x32xf32>
    %cst = arith.constant dense<0.000000e+00> : vector<8x32xf32>
    %3 = tpu.matmul %0, %2, %cst {dimension_numbers = #tpu.dot_dimension_numbers<[1], [0], [0], [1], [0, 0, 1, 1], [], []>} : vector<8x896xf32>, vector<896x32xf32>, vector<8x32xf32> -> vector<8x32xf32>
    %cst_3 = arith.constant dense<0.000000e+00> : vector<32xf32>
    %4 = vector.multi_reduction <add>, %3, %cst_3 [0] : vector<8x32xf32> to vector<32xf32>
    %5 = vector.shape_cast %4 : vector<32xf32> to vector<1x32xf32>
    %cst_4 = arith.constant 1.250000e-01 : f32
    %6 = vector.broadcast %cst_4 : f32 to vector<1x32xf32>
    %7 = arith.mulf %5, %6 : vector<1x32xf32>
    %8 = arith.mulf %3, %3 : vector<8x32xf32>
    %cst_5 = arith.constant dense<0.000000e+00> : vector<32xf32>
    %9 = vector.multi_reduction <add>, %8, %cst_5 [0] : vector<8x32xf32> to vector<32xf32>
    %10 = vector.shape_cast %9 : vector<32xf32> to vector<1x32xf32>
    %cst_6 = arith.constant 1.250000e-01 : f32
    %11 = vector.broadcast %cst_6 : f32 to vector<1x32xf32>
    %12 = arith.mulf %10, %11 : vector<1x32xf32>
    %13 = arith.mulf %7, %7 : vector<1x32xf32>
    %14 = arith.subf %12, %13 : vector<1x32xf32>
    %cst_7 = arith.constant 0.000000e+00 : f32
    %15 = vector.broadcast %cst_7 : f32 to vector<1x32xf32>
    %16 = arith.maximumf %14, %15 : vector<1x32xf32>
    %c0_8 = arith.constant 0 : index
    %c0_9 = arith.constant 0 : index
    %17 = vector.load %arg2[%c0_8, %c0_9] : memref<1x32xf32, #tpu.memory_space<vmem>>, vector<1x32xf32>
    %cst_10 = arith.constant 9.99999974E-6 : f32
    %18 = vector.broadcast %cst_10 : f32 to vector<1x32xf32>
    %19 = arith.addf %16, %18 : vector<1x32xf32>
    %20 = math.rsqrt %19 : vector<1x32xf32>
    %21 = arith.mulf %17, %20 : vector<1x32xf32>
    %c0_11 = arith.constant 0 : index
    %c0_12 = arith.constant 0 : index
    %22 = vector.load %arg3[%c0_11, %c0_12] : memref<1x32xf32, #tpu.memory_space<vmem>>, vector<1x32xf32>
    %23 = arith.mulf %7, %21 : vector<1x32xf32>
    %24 = arith.subf %22, %23 : vector<1x32xf32>
    %25 = vector.broadcast %21 : vector<1x32xf32> to vector<8x32xf32>
    %26 = arith.mulf %3, %25 : vector<8x32xf32>
    %27 = vector.broadcast %24 : vector<1x32xf32> to vector<8x32xf32>
    %28 = arith.addf %26, %27 : vector<8x32xf32>
    %cst_13 = arith.constant 0.000000e+00 : f32
    %29 = vector.broadcast %cst_13 : f32 to vector<8x32xf32>
    %30 = arith.maximumf %28, %29 : vector<8x32xf32>
    %c0_14 = arith.constant 0 : index
    %c0_15 = arith.constant 0 : index
    %31 = vector.load %arg4[%c0_14, %c0_15] : memref<32x32xbf16, #tpu.memory_space<vmem>>, vector<32x32xbf16>
    %32 = arith.extf %31 : vector<32x32xbf16> to vector<32x32xf32>
    %cst_16 = arith.constant dense<0.000000e+00> : vector<8x32xf32>
    %33 = tpu.matmul %30, %32, %cst_16 {dimension_numbers = #tpu.dot_dimension_numbers<[1], [0], [0], [1], [0, 0, 1, 1], [], []>} : vector<8x32xf32>, vector<32x32xf32>, vector<8x32xf32> -> vector<8x32xf32>
    %cst_17 = arith.constant dense<0.000000e+00> : vector<32xf32>
    %34 = vector.multi_reduction <add>, %33, %cst_17 [0] : vector<8x32xf32> to vector<32xf32>
    %35 = vector.shape_cast %34 : vector<32xf32> to vector<1x32xf32>
    %cst_18 = arith.constant 1.250000e-01 : f32
    %36 = vector.broadcast %cst_18 : f32 to vector<1x32xf32>
    %37 = arith.mulf %35, %36 : vector<1x32xf32>
    %38 = arith.mulf %33, %33 : vector<8x32xf32>
    %cst_19 = arith.constant dense<0.000000e+00> : vector<32xf32>
    %39 = vector.multi_reduction <add>, %38, %cst_19 [0] : vector<8x32xf32> to vector<32xf32>
    %40 = vector.shape_cast %39 : vector<32xf32> to vector<1x32xf32>
    %cst_20 = arith.constant 1.250000e-01 : f32
    %41 = vector.broadcast %cst_20 : f32 to vector<1x32xf32>
    %42 = arith.mulf %40, %41 : vector<1x32xf32>
    %43 = arith.mulf %37, %37 : vector<1x32xf32>
    %44 = arith.subf %42, %43 : vector<1x32xf32>
    %cst_21 = arith.constant 0.000000e+00 : f32
    %45 = vector.broadcast %cst_21 : f32 to vector<1x32xf32>
    %46 = arith.maximumf %44, %45 : vector<1x32xf32>
    %c0_22 = arith.constant 0 : index
    %c0_23 = arith.constant 0 : index
    %47 = vector.load %arg5[%c0_22, %c0_23] : memref<1x32xf32, #tpu.memory_space<vmem>>, vector<1x32xf32>
    %cst_24 = arith.constant 9.99999974E-6 : f32
    %48 = vector.broadcast %cst_24 : f32 to vector<1x32xf32>
    %49 = arith.addf %46, %48 : vector<1x32xf32>
    %50 = math.rsqrt %49 : vector<1x32xf32>
    %51 = arith.mulf %47, %50 : vector<1x32xf32>
    %c0_25 = arith.constant 0 : index
    %c0_26 = arith.constant 0 : index
    %52 = vector.load %arg6[%c0_25, %c0_26] : memref<1x32xf32, #tpu.memory_space<vmem>>, vector<1x32xf32>
    %53 = arith.mulf %37, %51 : vector<1x32xf32>
    %54 = arith.subf %52, %53 : vector<1x32xf32>
    %55 = vector.broadcast %51 : vector<1x32xf32> to vector<8x32xf32>
    %56 = arith.mulf %33, %55 : vector<8x32xf32>
    %57 = vector.broadcast %54 : vector<1x32xf32> to vector<8x32xf32>
    %58 = arith.addf %56, %57 : vector<8x32xf32>
    %cst_27 = arith.constant 0.000000e+00 : f32
    %59 = vector.broadcast %cst_27 : f32 to vector<8x32xf32>
    %60 = arith.maximumf %58, %59 : vector<8x32xf32>
    %c0_28 = arith.constant 0 : index
    %c0_29 = arith.constant 0 : index
    %61 = vector.load %arg7[%c0_28, %c0_29] : memref<32x20xbf16, #tpu.memory_space<vmem>>, vector<32x20xbf16>
    %62 = arith.extf %61 : vector<32x20xbf16> to vector<32x20xf32>
    %cst_30 = arith.constant dense<0.000000e+00> : vector<8x20xf32>
    %63 = tpu.matmul %60, %62, %cst_30 {dimension_numbers = #tpu.dot_dimension_numbers<[1], [0], [0], [1], [0, 0, 1, 1], [], []>} : vector<8x32xf32>, vector<32x20xf32>, vector<8x20xf32> -> vector<8x20xf32>
    %c0_31 = arith.constant 0 : index
    %c0_32 = arith.constant 0 : index
    %64 = vector.load %arg8[%c0_31, %c0_32] : memref<1x20xf32, #tpu.memory_space<vmem>>, vector<1x20xf32>
    %65 = vector.broadcast %64 : vector<1x20xf32> to vector<8x20xf32>
    %66 = arith.addf %63, %65 : vector<8x20xf32>
    %c0_33 = arith.constant 0 : index
    %c0_34 = arith.constant 0 : index
    %67 = vector.load %arg9[%c0_33, %c0_34] : memref<20x32xbf16, #tpu.memory_space<vmem>>, vector<20x32xbf16>
    %68 = arith.extf %67 : vector<20x32xbf16> to vector<20x32xf32>
    %cst_35 = arith.constant dense<0.000000e+00> : vector<8x32xf32>
    %69 = tpu.matmul %66, %68, %cst_35 {dimension_numbers = #tpu.dot_dimension_numbers<[1], [0], [0], [1], [0, 0, 1, 1], [], []>} : vector<8x20xf32>, vector<20x32xf32>, vector<8x32xf32> -> vector<8x32xf32>
    %cst_36 = arith.constant dense<0.000000e+00> : vector<32xf32>
    %70 = vector.multi_reduction <add>, %69, %cst_36 [0] : vector<8x32xf32> to vector<32xf32>
    %71 = vector.shape_cast %70 : vector<32xf32> to vector<1x32xf32>
    %cst_37 = arith.constant 1.250000e-01 : f32
    %72 = vector.broadcast %cst_37 : f32 to vector<1x32xf32>
    %73 = arith.mulf %71, %72 : vector<1x32xf32>
    %74 = arith.mulf %69, %69 : vector<8x32xf32>
    %cst_38 = arith.constant dense<0.000000e+00> : vector<32xf32>
    %75 = vector.multi_reduction <add>, %74, %cst_38 [0] : vector<8x32xf32> to vector<32xf32>
    %76 = vector.shape_cast %75 : vector<32xf32> to vector<1x32xf32>
    %cst_39 = arith.constant 1.250000e-01 : f32
    %77 = vector.broadcast %cst_39 : f32 to vector<1x32xf32>
    %78 = arith.mulf %76, %77 : vector<1x32xf32>
    %79 = arith.mulf %73, %73 : vector<1x32xf32>
    %80 = arith.subf %78, %79 : vector<1x32xf32>
    %cst_40 = arith.constant 0.000000e+00 : f32
    %81 = vector.broadcast %cst_40 : f32 to vector<1x32xf32>
    %82 = arith.maximumf %80, %81 : vector<1x32xf32>
    %c0_41 = arith.constant 0 : index
    %c0_42 = arith.constant 0 : index
    %83 = vector.load %arg10[%c0_41, %c0_42] : memref<1x32xf32, #tpu.memory_space<vmem>>, vector<1x32xf32>
    %cst_43 = arith.constant 9.99999974E-6 : f32
    %84 = vector.broadcast %cst_43 : f32 to vector<1x32xf32>
    %85 = arith.addf %82, %84 : vector<1x32xf32>
    %86 = math.rsqrt %85 : vector<1x32xf32>
    %87 = arith.mulf %83, %86 : vector<1x32xf32>
    %c0_44 = arith.constant 0 : index
    %c0_45 = arith.constant 0 : index
    %88 = vector.load %arg11[%c0_44, %c0_45] : memref<1x32xf32, #tpu.memory_space<vmem>>, vector<1x32xf32>
    %89 = arith.mulf %73, %87 : vector<1x32xf32>
    %90 = arith.subf %88, %89 : vector<1x32xf32>
    %91 = vector.broadcast %87 : vector<1x32xf32> to vector<8x32xf32>
    %92 = arith.mulf %69, %91 : vector<8x32xf32>
    %93 = vector.broadcast %90 : vector<1x32xf32> to vector<8x32xf32>
    %94 = arith.addf %92, %93 : vector<8x32xf32>
    %cst_46 = arith.constant 0.000000e+00 : f32
    %95 = vector.broadcast %cst_46 : f32 to vector<8x32xf32>
    %96 = arith.maximumf %94, %95 : vector<8x32xf32>
    %c0_47 = arith.constant 0 : index
    %c0_48 = arith.constant 0 : index
    %97 = vector.load %arg12[%c0_47, %c0_48] : memref<32x32xbf16, #tpu.memory_space<vmem>>, vector<32x32xbf16>
    %98 = arith.extf %97 : vector<32x32xbf16> to vector<32x32xf32>
    %cst_49 = arith.constant dense<0.000000e+00> : vector<8x32xf32>
    %99 = tpu.matmul %96, %98, %cst_49 {dimension_numbers = #tpu.dot_dimension_numbers<[1], [0], [0], [1], [0, 0, 1, 1], [], []>} : vector<8x32xf32>, vector<32x32xf32>, vector<8x32xf32> -> vector<8x32xf32>
    %cst_50 = arith.constant dense<0.000000e+00> : vector<32xf32>
    %100 = vector.multi_reduction <add>, %99, %cst_50 [0] : vector<8x32xf32> to vector<32xf32>
    %101 = vector.shape_cast %100 : vector<32xf32> to vector<1x32xf32>
    %cst_51 = arith.constant 1.250000e-01 : f32
    %102 = vector.broadcast %cst_51 : f32 to vector<1x32xf32>
    %103 = arith.mulf %101, %102 : vector<1x32xf32>
    %104 = arith.mulf %99, %99 : vector<8x32xf32>
    %cst_52 = arith.constant dense<0.000000e+00> : vector<32xf32>
    %105 = vector.multi_reduction <add>, %104, %cst_52 [0] : vector<8x32xf32> to vector<32xf32>
    %106 = vector.shape_cast %105 : vector<32xf32> to vector<1x32xf32>
    %cst_53 = arith.constant 1.250000e-01 : f32
    %107 = vector.broadcast %cst_53 : f32 to vector<1x32xf32>
    %108 = arith.mulf %106, %107 : vector<1x32xf32>
    %109 = arith.mulf %103, %103 : vector<1x32xf32>
    %110 = arith.subf %108, %109 : vector<1x32xf32>
    %cst_54 = arith.constant 0.000000e+00 : f32
    %111 = vector.broadcast %cst_54 : f32 to vector<1x32xf32>
    %112 = arith.maximumf %110, %111 : vector<1x32xf32>
    %c0_55 = arith.constant 0 : index
    %c0_56 = arith.constant 0 : index
    %113 = vector.load %arg13[%c0_55, %c0_56] : memref<1x32xf32, #tpu.memory_space<vmem>>, vector<1x32xf32>
    %cst_57 = arith.constant 9.99999974E-6 : f32
    %114 = vector.broadcast %cst_57 : f32 to vector<1x32xf32>
    %115 = arith.addf %112, %114 : vector<1x32xf32>
    %116 = math.rsqrt %115 : vector<1x32xf32>
    %117 = arith.mulf %113, %116 : vector<1x32xf32>
    %c0_58 = arith.constant 0 : index
    %c0_59 = arith.constant 0 : index
    %118 = vector.load %arg14[%c0_58, %c0_59] : memref<1x32xf32, #tpu.memory_space<vmem>>, vector<1x32xf32>
    %119 = arith.mulf %103, %117 : vector<1x32xf32>
    %120 = arith.subf %118, %119 : vector<1x32xf32>
    %121 = vector.broadcast %117 : vector<1x32xf32> to vector<8x32xf32>
    %122 = arith.mulf %99, %121 : vector<8x32xf32>
    %123 = vector.broadcast %120 : vector<1x32xf32> to vector<8x32xf32>
    %124 = arith.addf %122, %123 : vector<8x32xf32>
    %cst_60 = arith.constant 0.000000e+00 : f32
    %125 = vector.broadcast %cst_60 : f32 to vector<8x32xf32>
    %126 = arith.maximumf %124, %125 : vector<8x32xf32>
    %c0_61 = arith.constant 0 : index
    %c0_62 = arith.constant 0 : index
    %127 = vector.load %arg15[%c0_61, %c0_62] : memref<32x896xbf16, #tpu.memory_space<vmem>>, vector<32x896xbf16>
    %128 = arith.extf %127 : vector<32x896xbf16> to vector<32x896xf32>
    %cst_63 = arith.constant dense<0.000000e+00> : vector<8x896xf32>
    %129 = tpu.matmul %126, %128, %cst_63 {dimension_numbers = #tpu.dot_dimension_numbers<[1], [0], [0], [1], [0, 0, 1, 1], [], []>} : vector<8x32xf32>, vector<32x896xf32>, vector<8x896xf32> -> vector<8x896xf32>
    %cst_64 = arith.constant dense<0.000000e+00> : vector<896xf32>
    %130 = vector.multi_reduction <add>, %129, %cst_64 [0] : vector<8x896xf32> to vector<896xf32>
    %131 = vector.shape_cast %130 : vector<896xf32> to vector<1x896xf32>
    %cst_65 = arith.constant 1.250000e-01 : f32
    %132 = vector.broadcast %cst_65 : f32 to vector<1x896xf32>
    %133 = arith.mulf %131, %132 : vector<1x896xf32>
    %134 = arith.mulf %129, %129 : vector<8x896xf32>
    %cst_66 = arith.constant dense<0.000000e+00> : vector<896xf32>
    %135 = vector.multi_reduction <add>, %134, %cst_66 [0] : vector<8x896xf32> to vector<896xf32>
    %136 = vector.shape_cast %135 : vector<896xf32> to vector<1x896xf32>
    %cst_67 = arith.constant 1.250000e-01 : f32
    %137 = vector.broadcast %cst_67 : f32 to vector<1x896xf32>
    %138 = arith.mulf %136, %137 : vector<1x896xf32>
    %139 = arith.mulf %133, %133 : vector<1x896xf32>
    %140 = arith.subf %138, %139 : vector<1x896xf32>
    %cst_68 = arith.constant 0.000000e+00 : f32
    %141 = vector.broadcast %cst_68 : f32 to vector<1x896xf32>
    %142 = arith.maximumf %140, %141 : vector<1x896xf32>
    %c0_69 = arith.constant 0 : index
    %c0_70 = arith.constant 0 : index
    %143 = vector.load %arg16[%c0_69, %c0_70] : memref<1x896xf32, #tpu.memory_space<vmem>>, vector<1x896xf32>
    %cst_71 = arith.constant 9.99999974E-6 : f32
    %144 = vector.broadcast %cst_71 : f32 to vector<1x896xf32>
    %145 = arith.addf %142, %144 : vector<1x896xf32>
    %146 = math.rsqrt %145 : vector<1x896xf32>
    %147 = arith.mulf %143, %146 : vector<1x896xf32>
    %c0_72 = arith.constant 0 : index
    %c0_73 = arith.constant 0 : index
    %148 = vector.load %arg17[%c0_72, %c0_73] : memref<1x896xf32, #tpu.memory_space<vmem>>, vector<1x896xf32>
    %149 = arith.mulf %133, %147 : vector<1x896xf32>
    %150 = arith.subf %148, %149 : vector<1x896xf32>
    %151 = vector.broadcast %147 : vector<1x896xf32> to vector<8x896xf32>
    %152 = arith.mulf %129, %151 : vector<8x896xf32>
    %153 = vector.broadcast %150 : vector<1x896xf32> to vector<8x896xf32>
    %154 = arith.addf %152, %153 : vector<8x896xf32>
    %c0_74 = arith.constant 0 : index
    %c0_75 = arith.constant 0 : index
    %155 = vector.load %arg18[%c0_74, %c0_75] : memref<8x896xf32, #tpu.memory_space<vmem>>, vector<8x896xf32>
    tpu.vector_store %arg18[%c0_74, %c0_75], %154 {strides = array<i32>} : memref<8x896xf32, #tpu.memory_space<vmem>>, vector<8x896xf32>,
    return
  }
}

</mosaic_0001>

<bundles_post_ra>
// kernel: autoencoder_forward.1
= control target key start
LH: loop header
LB: loop body
LE: loop exit
PB: predicated region body
PF: predicated region fallthrough
CT: control target
= control target key end

     0   :  { %s3150_s0 = inlined_call_operand.vmem [shape: f32[8,896], index: 0, kind: input, shape index: {}]   ;;  %s3151_s1 = inlined_call_operand.vmem [shape: bf16[896,32], index: 1, kind: input, shape index: {}]   ;;  %s3152_s2 = inlined_call_operand.vmem [shape: f32[1,32], index: 2, kind: input, shape index: {}]   ;;  %s3153_s3 = inlined_call_operand.vmem [shape: f32[1,32], index: 3, kind: input, shape index: {}]   ;;  %s3154_s4 = inlined_call_operand.vmem [shape: bf16[32,32], index: 4, kind: input, shape index: {}]   ;;  %s3155_s5 = inlined_call_operand.vmem [shape: f32[1,32], index: 5, kind: input, shape index: {}]   ;;  %s3156_s6 = inlined_call_operand.vmem [shape: f32[1,32], index: 6, kind: input, shape index: {}]   ;;  %s3157_s7 = inlined_call_operand.vmem [shape: bf16[32,20], index: 7, kind: input, shape index: {}]   ;;  %s3158_s8 = inlined_call_operand.vmem [shape: f32[1,20], index: 8, kind: input, shape index: {}]   ;;  %s3159_s9 = inlined_call_operand.vmem [shape: bf16[20,32], index: 9, kind: input, shape index: {}]   ;;  %s3160_s10 = inlined_call_operand.vmem [shape: f32[1,32], index: 10, kind: input, shape index: {}]   ;;  %s3161_s11 = inlined_call_operand.vmem [shape: f32[1,32], index: 11, kind: input, shape index: {}]   ;;  %s3162_s12 = inlined_call_operand.vmem [shape: bf16[32,32], index: 12, kind: input, shape index: {}]   ;;  %s3163_s13 = inlined_call_operand.vmem [shape: f32[1,32], index: 13, kind: input, shape index: {}]   ;;  %s3164_s14 = inlined_call_operand.vmem [shape: f32[1,32], index: 14, kind: input, shape index: {}]   ;;  %s3165_s15 = inlined_call_operand.vmem [shape: bf16[32,896], index: 15, kind: input, shape index: {}]   ;;  %s3166_s16 = inlined_call_operand.vmem [shape: f32[1,896], index: 16, kind: input, shape index: {}]   ;;  %s3167_s17 = inlined_call_operand.vmem [shape: f32[1,896], index: 17, kind: input, shape index: {}]   ;;  %s3168_s18 = inlined_call_operand.hbm [shape: f32[8,896], index: 18, kind: output, shape index: {}]  }
   0x1   :  { %3171 = sst [smem:[#allocation5_spill]] %s3150_s0 }
   0x2   :  { %3172 = sst [smem:[#allocation6_spill]] %s3151_s1 }
   0x3   :  { %3173 = sst [smem:[#allocation7_spill]] %s3152_s2 }
   0x4   :  { %s3174_s29 = sld [smem:[#allocation6_spill]]  ;;  %s3175_s30 = sld [smem:[#allocation5_spill]] }
   0xa   :  { %v2043_v0 = vld [vmem:[%s3174_s29 + $0x40] sm:$0xff]   ;;  %v2044_v4 = vld [vmem:[%s3174_s29 + $0x48] sm:$0xff]   ;;  %v2045_v8 = vld [vmem:[%s3174_s29 + $0x50] sm:$0xff]  }
   0xb   :  { %v2059_v1 = vld [vmem:[%s3174_s29 + $0xc0] sm:$0xff]   ;;  %2329 = vmatprep.subr.bf16.mxu0 %v2043_v0  ;;  %v2060_v5 = vld [vmem:[%s3174_s29 + $0xc8] sm:$0xff]   ;;  %v2061_v9 = vld [vmem:[%s3174_s29 + $0xd0] sm:$0xff]  }
   0xc   :  { %v1785_v2 = vld [vmem:[%s3174_s29] sm:$0xff]   ;;  %2361 = vmatprep.subr.bf16.mxu1 %v2059_v1  ;;  %v2036_v6 = vld [vmem:[%s3174_s29 + $0x8] sm:$0xff]   ;;  %v2037_v10 = vld [vmem:[%s3174_s29 + $0x10] sm:$0xff]  }
   0xd   :  { %v2051_v3 = vld [vmem:[%s3174_s29 + $0x80] sm:$0xff]   ;;  %2331 = vmatpush3.bf16.msra.mxu0 %v1785_v2  ;;  %v2052_v7 = vld [vmem:[%s3174_s29 + $0x88] sm:$0xff]   ;;  %v2053_v11 = vld [vmem:[%s3174_s29 + $0x90] sm:$0xff]  }
   0xe   :  { %2363 = vmatpush3.bf16.msra.mxu1 %v2051_v3  ;;  %2333 = vmatprep.subr.bf16.mxu0 %v2044_v4  ;;  %v2046_v12 = vld [vmem:[%s3174_s29 + $0x58] sm:$0xff]   ;;  %v61_v14 = vld [vmem:[%s3175_s30 + $0x8] sm:$0xff]  ;;  %v2047_v18 = vld [vmem:[%s3174_s29 + $0x60] sm:$0xff]  }
   0xf   :  { %2365 = vmatprep.subr.bf16.mxu1 %v2060_v5  ;;  %v2062_v13 = vld [vmem:[%s3174_s29 + $0xd8] sm:$0xff]   ;;  %v2063_v19 = vld [vmem:[%s3174_s29 + $0xe0] sm:$0xff]   ;;  %355 = vmatprep.mubr.f32.mxu0 %v61_v14  ;;  %v2048_v22 = vld [vmem:[%s3174_s29 + $0x68] sm:$0xff]  }
  0x10   :  { %v2038_v15 = vld [vmem:[%s3174_s29 + $0x18] sm:$0xff]   ;;  %v2039_v20 = vld [vmem:[%s3174_s29 + $0x20] sm:$0xff]   ;;  %v2064_v23 = vld [vmem:[%s3174_s29 + $0xe8] sm:$0xff]  }
  0x11   :  { %2335 = vmatpush3.bf16.msra.mxu0 %v2036_v6  ;;  %v2054_v16 = vld [vmem:[%s3174_s29 + $0x98] sm:$0xff]   ;;  %v2055_v21 = vld [vmem:[%s3174_s29 + $0xa0] sm:$0xff]   ;;  %v2040_v24 = vld [vmem:[%s3174_s29 + $0x28] sm:$0xff]  }
  0x12   :  { %2367 = vmatpush3.bf16.msra.mxu1 %v2052_v7  ;;  %2337 = vmatprep.subr.bf16.mxu0 %v2045_v8  ;;  %v63_v17 = vld [vmem:[%s3175_s30 + $0x18] sm:$0xff]  ;;  %v2056_v25 = vld [vmem:[%s3174_s29 + $0xa8] sm:$0xff]   ;;  %v2049_v26 = vld [vmem:[%s3174_s29 + $0x70] sm:$0xff]  }
  0x13   :  { %2369 = vmatprep.subr.bf16.mxu1 %v2061_v9  ;;  %425 = vmatprep.mubr.f32.mxu1 %v63_v17  ;;  %v2065_v27 = vld [vmem:[%s3174_s29 + $0xf0] sm:$0xff]   ;;  %v2050_v30 = vld [vmem:[%s3174_s29 + $0x78] sm:$0xff]  }
  0x14   :  { %v2041_v28 = vld [vmem:[%s3174_s29 + $0x30] sm:$0xff]   ;;  %v2066_v31 = vld [vmem:[%s3174_s29 + $0xf8] sm:$0xff]  }
  0x15   :  { %2339 = vmatpush3.bf16.msra.mxu0 %v2037_v10  ;;  %v2057_v29 = vld [vmem:[%s3174_s29 + $0xb0] sm:$0xff]  }
  0x16   :  { %2371 = vmatpush3.bf16.msra.mxu1 %v2053_v11  ;;  %2341 = vmatprep.subr.bf16.mxu0 %v2046_v12 }
  0x17   :  { %2373 = vmatprep.subr.bf16.mxu1 %v2062_v13 }
  0x19   :  { %2343 = vmatpush3.bf16.msra.mxu0 %v2038_v15 }
  0x1a   :  { %2375 = vmatpush3.bf16.msra.mxu1 %v2054_v16  ;;  %2345 = vmatprep.subr.bf16.mxu0 %v2047_v18 }
  0x1b   :  { %2377 = vmatprep.subr.bf16.mxu1 %v2063_v19 }
  0x1d   :  { %2347 = vmatpush3.bf16.msra.mxu0 %v2039_v20 }
  0x1e   :  { %2379 = vmatpush3.bf16.msra.mxu1 %v2055_v21  ;;  %2349 = vmatprep.subr.bf16.mxu0 %v2048_v22 }
  0x1f   :  { %2381 = vmatprep.subr.bf16.mxu1 %v2064_v23 }
  0x21   :  { %2351 = vmatpush3.bf16.msra.mxu0 %v2040_v24 }
  0x22   :  { %2383 = vmatpush3.bf16.msra.mxu1 %v2056_v25  ;;  %2353 = vmatprep.subr.bf16.mxu0 %v2049_v26 }
  0x23   :  { %2385 = vmatprep.subr.bf16.mxu1 %v2065_v27 }
  0x25   :  { %2355 = vmatpush3.bf16.msra.mxu0 %v2041_v28 }
  0x26   :  { %2387 = vmatpush3.bf16.msra.mxu1 %v2057_v29 }
  0x27   :  { %23 = vsyncpa [#allocation3], 0  ;;  %2357 = vmatprep.subr.bf16.mxu0 %v2050_v30  ;;  %2389 = vmatprep.subr.bf16.mxu1 %v2066_v31  ;;  %v2042_v32 = vld [vmem:[%s3174_s29 + $0x38] sm:$0xff]   ;;  %v2075_v34 = vld [vmem:[%s3174_s29 + $0x140] sm:$0xff]   ;;  %v2584_v38 = vmov 0.0|0.0   ;;  %vm2585_vm0 = vmmov 0  }
  0x28   :  { %v2058_v33 = vld [vmem:[%s3174_s29 + $0xb8] sm:$0xff]   ;;  %v60_v35 = vld [vmem:[%s3175_s30] sm:$0xff]  ;;  %v62_v36 = vld [vmem:[%s3175_s30 + $0x10] sm:$0xff]  ;;  %v2586_v45 = vmov 0.0   ;;  %vm571_vm1 = vcmask 261120   ;;  %s3176_s24 = sld [smem:[#allocation7_spill]] }
  0x29   :  { %2359 = vmatpush3.bf16.msra.mxu0 %v2042_v32  ;;  %v2067_v37 = vld [vmem:[%s3174_s29 + $0x100] sm:$0xff]   ;;  %v2076_v40 = vld [vmem:[%s3174_s29 + $0x148] sm:$0xff]   ;;  %v2077_v44 = vld [vmem:[%s3174_s29 + $0x150] sm:$0xff]   ;;  %vm835_vm2 = vcmask 1043456   ;;  %vm831_vm3 = vcmask 162816   ;;  %s2588_s19 = smov [#allocation2]  }
  0x2a   :  { %2391 = vmatpush3.bf16.msra.mxu1 %v2058_v33  ;;  %2393 = vmatprep.subr.bf16.mxu0 %v2075_v34  ;;  %v2083_v39 = vld [vmem:[%s3174_s29 + $0x180] sm:$0xff]   ;;  %v65_v41 = vld [vmem:[%s3175_s30 + $0x28] sm:$0xff]  ;;  %v2069_v46 = vld [vmem:[%s3174_s29 + $0x110] sm:$0xff]   ;;  %s1766_s1 = sshll.u32 %s2588_s19, 4  ;;  %s1767_s1 = int_to_ptr.vmem [resolvable:$true] %s1766_s1 }
  0x2b   :  { %2424 = vmatprep.subr.bf16.mxu1 %v2584_v38  ;;  %v2068_v42 = vld [vmem:[%s3174_s29 + $0x108] sm:$0xff]   ;;  %v2085_v47 = vld [vmem:[%s3174_s29 + $0x190] sm:$0xff]   ;;  %v2078_v48 = vld [vmem:[%s3174_s29 + $0x158] sm:$0xff]   ;;  %p2565_p1 = scmp.lt.s32.totalorder %s1767_s1, %s1767_s1 }
  0x2c   :  { %356 = vmatmul.mubr.f32.vlgmr.msra.gmra.mrb[0].mxu0 %v60_v35  ;;  %v2084_v43 = vld [vmem:[%s3174_s29 + $0x188] sm:$0xff]   ;;  %v2070_v49 = vld [vmem:[%s3174_s29 + $0x118] sm:$0xff]   ;;  %v2079_v51 = vld [vmem:[%s3174_s29 + $0x160] sm:$0xff]  }
  0x2d   :  { %426 = vmatmul.mubr.f32.vlgmr.msra.gmra.mrb[0].mxu1 %v62_v36  ;;  %2395 = vmatpush3.bf16.msra.mxu0 %v2067_v37  ;;  %v2086_v50 = vld [vmem:[%s3174_s29 + $0x198] sm:$0xff]   ;;  %v2071_v52 = vld [vmem:[%s3174_s29 + $0x120] sm:$0xff]   ;;  %v2080_v54 = vld [vmem:[%s3174_s29 + $0x168] sm:$0xff]  }
  0x2e   :  { %2426 = vmatpush3.bf16.msra.mxu1 %v2083_v39  ;;  %2397 = vmatprep.subr.bf16.mxu0 %v2076_v40  ;;  %v2087_v53 = vld [vmem:[%s3174_s29 + $0x1a0] sm:$0xff]   ;;  %v2072_v55 = vld [vmem:[%s3174_s29 + $0x128] sm:$0xff]   ;;  %v2081_v57 = vld [vmem:[%s3174_s29 + $0x170] sm:$0xff]   ;;  %v600_v39 = vlaneseq }
  0x2f   :  { %2427 = vmatprep.subr.bf16.mxu1 %v2584_v38  ;;  %495 = vmatprep.mubr.f32.mxu0 %v65_v41  ;;  %v2088_v56 = vld [vmem:[%s3174_s29 + $0x1a8] sm:$0xff]   ;;  %v2073_v58 = vld [vmem:[%s3174_s29 + $0x130] sm:$0xff]   ;;  %v2082_v60 = vld [vmem:[%s3174_s29 + $0x178] sm:$0xff]  }
  0x30   :  { %2272 = vmatprep.mubr.msk.f32.mxu1 %vm2585_vm0, %v2586_v45  ;;  %v2089_v59 = vld [vmem:[%s3174_s29 + $0x1b0] sm:$0xff]   ;;  %v2074_v61 = vld [vmem:[%s3174_s29 + $0x138] sm:$0xff]   ;;  %v64_v63 = vld [vmem:[%s3175_s30 + $0x20] sm:$0xff]  ;;  %v2899_v40 = vshrl.u32 %v600_v39, 7 }
  0x31   :  { %2399 = vmatpush3.bf16.msra.mxu0 %v2068_v42  ;;  %v2090_v62 = vld [vmem:[%s3174_s29 + $0x1b8] sm:$0xff]   ;;  %v66_v0 = vld [vmem:[%s3175_s30 + $0x30] sm:$0xff]  ;;  %v2009_v1 = vld [vmem:[%s3154_s4] sm:$0xff]  }
  0x32   :  { %2429 = vmatpush3.bf16.msra.mxu1 %v2084_v43  ;;  %2401 = vmatprep.subr.bf16.mxu0 %v2077_v44  ;;  %v2091_v2 = vld [vmem:[%s3154_s4 + $0x8] sm:$0xff]   ;;  %v592_v41 = vld [vmem:[%s3176_s24] sm:$0x1]  ;;  %v2905_v42 = vsub.s32 0, %v2899_v40 }
  0x33   :  { %2430 = vmatprep.subr.bf16.mxu1 %v2584_v38 }
  0x35   :  { %2403 = vmatpush3.bf16.msra.mxu0 %v2069_v46  ;;  %v596_v46 = vld [vmem:[%s3153_s3] sm:$0x1] }
  0x36   :  { %2432 = vmatpush3.bf16.msra.mxu1 %v2085_v47  ;;  %2405 = vmatprep.subr.bf16.mxu0 %v2078_v48 }
  0x37   :  { %2433 = vmatprep.subr.bf16.mxu1 %v2584_v38 }
  0x39   :  { %2407 = vmatpush3.bf16.msra.mxu0 %v2070_v49 }
  0x3a   :  { %2435 = vmatpush3.bf16.msra.mxu1 %v2086_v50  ;;  %2409 = vmatprep.subr.bf16.mxu0 %v2079_v51 }
  0x3b   :  { %2436 = vmatprep.subr.bf16.mxu1 %v2584_v38 }
  0x3d   :  { %2411 = vmatpush3.bf16.msra.mxu0 %v2071_v52 }
  0x3e   :  { %2438 = vmatpush3.bf16.msra.mxu1 %v2087_v53  ;;  %2413 = vmatprep.subr.bf16.mxu0 %v2080_v54  ;;  %v2017_v54 = vld [vmem:[%s3157_s7] sm:$0xff]  }
  0x3f   :  { %2439 = vmatprep.subr.bf16.mxu1 %v2584_v38 }
  0x41   :  { %2415 = vmatpush3.bf16.msra.mxu0 %v2072_v55  ;;  %v2092_v55 = vld [vmem:[%s3157_s7 + $0x8] sm:$0xff]  }
  0x42   :  { %2441 = vmatpush3.bf16.msra.mxu1 %v2088_v56  ;;  %2417 = vmatprep.subr.bf16.mxu0 %v2081_v57  ;;  %v2025_v56 = vld [vmem:[%s3159_s9] sm:$0xff]  }
  0x43   :  { %2442 = vmatprep.subr.bf16.mxu1 %v2584_v38 }
  0x45   :  { %2419 = vmatpush3.bf16.msra.mxu0 %v2073_v58 }
  0x46   :  { %2444 = vmatpush3.bf16.msra.mxu1 %v2089_v59  ;;  %2421 = vmatprep.subr.bf16.mxu0 %v2082_v60 }
  0x47   :  { %2445 = vmatprep.subr.bf16.mxu1 %v2584_v38 }
  0x49   :  { %2423 = vmatpush3.bf16.msra.mxu0 %v2074_v61 }
  0x4a   :  { %2447 = vmatpush3.bf16.msra.mxu1 %v2090_v62  ;;  %2448 = vmatprep.subr.bf16.mxu0 %v2584_v38 }
  0x4b   :  { %2454 = vmatprep.subr.bf16.mxu1 %v2584_v38 }
  0x4c   :  { %496 = vmatmul.mubr.f32.vlgmr.msra.gmra.mrb[2].mxu0 %v64_v63 }
  0x4d   :  { %2273 = vmatmul.mubr.f32.vlgmr.msra.gmra.mrb[2].mxu1 %v66_v0  ;;  %2283 = vmatprep.mubr.msk.f32.mxu0 %vm2585_vm0, %v2586_v45 }
  0x4e   :  { %2294 = vmatprep.mubr.msk.f32.mxu1 %vm2585_vm0, %v2586_v45  ;;  %2450 = vmatpush3.bf16.msra.mxu0 %v2009_v1 }
  0x4f   :  { %2451 = vmatprep.subr.bf16.mxu0 %v2584_v38  ;;  %2456 = vmatpush3.bf16.msra.mxu1 %v2017_v54 }
  0x50   :  { %2457 = vmatprep.subr.bf16.mxu1 %v2584_v38 }
  0x52   :  { %2453 = vmatpush3.bf16.msra.mxu0 %v2091_v2 }
  0x53   :  { %2460 = vmatprep.subr.bf16.mxu0 %v2584_v38  ;;  %2459 = vmatpush3.bf16.msra.mxu1 %v2092_v55 }
  0x54   :  { %2463 = vmatprep.subr.bf16.mxu1 %v2584_v38 }
  0xff   :  { %v2126_v3 = vpop.f32.mrb[0].mxu0 }
 0x100   :  { %v2161_v4 = vpop.f32.mrb[0].mxu1  ;;  %v2127_v5 = vpop.f32.mrb[1].mxu0 }
 0x101   :  { %v2162_v6 = vpop.f32.mrb[1].mxu1  ;;  %v2128_v7 = vadd.f32 %v2127_v5, %v2126_v3 }
 0x102   :  { %v2163_v8 = vadd.f32 %v2162_v6, %v2161_v4 }
 0x104   :  { %v428_v9 = vadd.f32 %v2163_v8, %v2128_v7 }
 0x11f   :  { %v2196_v10 = vpop.f32.mrb[2].mxu0 }
 0x120   :  { %v567_v11 = vpop.f32.mrb[2].mxu1  ;;  %v2197_v12 = vpop.f32.mrb[3].mxu0 }
 0x121   :  { %v2274_v13 = vpop.f32.mrb[3].mxu1  ;;  %v2198_v14 = vadd.f32 %v2197_v12, %v2196_v10 }
 0x123   :  { %v498_v15 = vadd.f32 %v2198_v14, %v428_v9 }
 0x125   :  { %v568_v16 = vadd.f32 %v567_v11, %v498_v15 }
 0x127   :  { %v572_v17 = vsel %vm571_vm1, %v568_v16, 0.0  ;;  %v580_v18 = vmul.f32 %v568_v16, %v568_v16 }
 0x128   :  { %v573_v19 = vrot.slane %v572_v17, 4 }
 0x129   :  { %v581_v20 = vsel %vm571_vm1, %v580_v18, 0.0 }
 0x12a   :  { %v574_v21 = vadd.f32 %v573_v19, %v572_v17  ;;  %v582_v22 = vrot.slane %v581_v20, 4  ;;  %v719_v19 = vld [vmem:[%s3156_s6] sm:$0x1] }
 0x12c   :  { %v575_v23 = vrot.slane %v574_v21, 2  ;;  %v583_v24 = vadd.f32 %v582_v22, %v581_v20 }
 0x12e   :  { %v576_v25 = vadd.f32 %v575_v23, %v574_v21  ;;  %v584_v26 = vrot.slane %v583_v24, 2 }
 0x130   :  { %v577_v27 = vrot.slane %v576_v25, 1  ;;  %v585_v28 = vadd.f32 %v584_v26, %v583_v24 }
 0x132   :  { %v578_v29 = vadd.f32 %v577_v27, %v576_v25  ;;  %v586_v30 = vrot.slane %v585_v28, 1  ;;  %v827_v27 = vld [vmem:[%s3159_s9 + $0x8] sm:$0x3] }
 0x134   :  { %v579_v31 = vmul.f32 0.125, %v578_v29  ;;  %v587_v32 = vadd.f32 %v586_v30, %v585_v28  ;;  %v830_v28 = vunpack.c.l.bf16 %v827_v27  ;;  %v1775_v29 = vld [vmem:[%s3158_s8] ss:$0 sm:$0xff] }
 0x136   :  { %v588_v33 = vmul.f32 0.125, %v587_v32  ;;  %v589_v34 = vmul.f32 %v579_v31, %v579_v31 }
 0x138   :  { %v590_v35 = vsub.f32 %v588_v33, %v589_v34  ;;  %v2029_v33 = vld [vmem:[%s3162_s12] sm:$0xff]   ;;  %v2093_v34 = vld [vmem:[%s3162_s12 + $0x8] sm:$0xff]  }
 0x13a   :  { %v591_v36 = vmax.f32 %v590_v35, 0.0 }
 0x13c   :  { %v593_v37 = vadd.f32 1e-05, %v591_v36 }
 0x13e   :  { %2538 = vrsqrt.f32 %v593_v37 }
 0x148   :  { %v2539_v43 = vpop.eup %2538 }
 0x149   :  { %v595_v44 = vmul.f32 %v2539_v43, %v592_v41 }
 0x14b   :  { %v597_v47 = vmul.f32 %v595_v44, %v579_v31  ;;  %v603_v48 = vrot.slane %v595_v44, %v2905_v42 }
 0x14d   :  { %v598_v49 = vsub.f32 %v596_v46, %v597_v47  ;;  %v605_v50 = vmul.f32 %v603_v48, %v568_v16  ;;  %v715_v16 = vld [vmem:[%s3155_s5] sm:$0x1] }
 0x14f   :  { %v610_v51 = vrot.slane %v598_v49, %v2905_v42 }
 0x151   :  { %v612_v52 = vadd.f32 %v610_v51, %v605_v50 }
 0x153   :  { %v613_v53 = vmax.f32 %v612_v52, 0.0 }
 0x155   :  { %2284 = vmatmul.mubr.msk.f32.vlgmr.msra.gmra.mrb[4].mxu0 %vm571_vm1, %v613_v53 }
 0x156   :  { %2303 = vmatprep.mubr.msk.f32.mxu0 %vm2585_vm0, %v2586_v45  ;;  %2462 = vmatpush3.bf16.msra.mxu0 %v2025_v56 }
 0x157   :  { %2301 = vmatprep.subr.mxu0 %v2586_v45 }
 0x15a   :  { %2302 = vmatpush3.msk.msra.mxu0 %vm835_vm2, %v830_v28 }
 0x228   :  { %v691_v57 = vpop.f32.mrb[4].mxu0 }
 0x229   :  { %v695_v58 = vsel %vm571_vm1, %v691_v57, 0.0  ;;  %v703_v59 = vmul.f32 %v691_v57, %v691_v57  ;;  %v2285_v60 = vpop.f32.mrb[5].mxu0 }
 0x22a   :  { %v696_v61 = vrot.slane %v695_v58, 4 }
 0x22b   :  { %v704_v62 = vsel %vm571_vm1, %v703_v59, 0.0 }
 0x22c   :  { %v697_v63 = vadd.f32 %v696_v61, %v695_v58  ;;  %v705_v0 = vrot.slane %v704_v62, 4 }
 0x22e   :  { %v698_v1 = vrot.slane %v697_v63, 2  ;;  %v706_v2 = vadd.f32 %v705_v0, %v704_v62  ;;  %v929_v62 = vld [vmem:[%s3160_s10] sm:$0x1] }
 0x230   :  { %v699_v3 = vadd.f32 %v698_v1, %v697_v63  ;;  %v707_v4 = vrot.slane %v706_v2, 2  ;;  %v933_v1 = vld [vmem:[%s3161_s11] sm:$0x1] }
 0x232   :  { %v700_v5 = vrot.slane %v699_v3, 1  ;;  %v708_v6 = vadd.f32 %v707_v4, %v706_v2 }
 0x234   :  { %v701_v7 = vadd.f32 %v700_v5, %v699_v3  ;;  %v709_v8 = vrot.slane %v708_v6, 1 }
 0x236   :  { %v702_v9 = vmul.f32 0.125, %v701_v7  ;;  %v710_v10 = vadd.f32 %v709_v8, %v708_v6 }
 0x238   :  { %v711_v11 = vmul.f32 0.125, %v710_v10  ;;  %v712_v12 = vmul.f32 %v702_v9, %v702_v9  ;;  %v2521_v10 = vld [vmem:[%s3165_s15 + $0xc] ss:$28 sps:$4 sm:$0xff]  }
 0x23a   :  { %v713_v13 = vsub.f32 %v711_v11, %v712_v12  ;;  %v2520_v11 = vld [vmem:[%s3165_s15] ss:$28 sps:$4 sm:$0xff]   ;;  %v2523_v12 = vld [vmem:[%s3165_s15 + $0x8] ss:$28 sps:$4 sm:$0xff]  }
 0x23c   :  { %v714_v14 = vmax.f32 %v713_v13, 0.0  ;;  %v2524_v13 = vld [vmem:[%s3165_s15 + $0x3c] ss:$28 sps:$4 sm:$0xff]  }
 0x23e   :  { %v716_v15 = vadd.f32 1e-05, %v714_v14  ;;  %v2527_v14 = vld [vmem:[%s3165_s15 + $0x44] ss:$28 sps:$4 sm:$0xff]  }
 0x240   :  { %2540 = vrsqrt.f32 %v716_v15  ;;  %v2526_v15 = vld [vmem:[%s3165_s15 + $0x38] ss:$28 sps:$4 sm:$0xff]  }
 0x24a   :  { %v2541_v17 = vpop.eup %2540 }
 0x24b   :  { %v718_v18 = vmul.f32 %v2541_v17, %v715_v16  ;;  %v2529_v16 = vld [vmem:[%s3165_s15 + $0x40] ss:$28 sps:$4 sm:$0xff]   ;;  %v2530_v17 = vld [vmem:[%s3165_s15 + $0x14] ss:$28 sps:$4 sm:$0xff]  }
 0x24d   :  { %v720_v20 = vmul.f32 %v718_v18, %v702_v9  ;;  %v726_v21 = vrot.slane %v718_v18, %v2905_v42  ;;  %v2518_v9 = vld [vmem:[%s3165_s15 + $0x4] ss:$28 sps:$4 sm:$0xff]  }
 0x24e   :  { %2470 = vmatprep.subr.bf16.mxu0 %v2518_v9 }
 0x24f   :  { %v721_v22 = vsub.f32 %v719_v19, %v720_v20  ;;  %v728_v23 = vmul.f32 %v726_v21, %v691_v57 }
 0x251   :  { %v733_v24 = vrot.slane %v721_v22, %v2905_v42 }
 0x253   :  { %v735_v25 = vadd.f32 %v733_v24, %v728_v23 }
 0x255   :  { %v736_v26 = vmax.f32 %v735_v25, 0.0 }
 0x257   :  { %2295 = vmatmul.mubr.msk.f32.vlgmr.msra.gmra.mrb[4].mxu1 %vm571_vm1, %v736_v26 }
 0x258   :  { %2314 = vmatprep.mubr.msk.f32.mxu1 %vm2585_vm0, %v2586_v45  ;;  %2465 = vmatpush3.bf16.msra.mxu1 %v2029_v33 }
 0x259   :  { %2466 = vmatprep.subr.bf16.mxu1 %v2584_v38 }
 0x25c   :  { %2468 = vmatpush3.bf16.msra.mxu1 %v2093_v34 }
 0x25d   :  { %2478 = vmatprep.subr.bf16.mxu1 %v2521_v10 }
 0x32a   :  { %v821_v30 = vpop.f32.mrb[4].mxu1 }
 0x32b   :  { %v822_v31 = vadd.f32 %v1775_v29, %v821_v30  ;;  %v2296_v32 = vpop.f32.mrb[5].mxu1 }
 0x32d   :  { %2304 = vmatmul.mubr.msk.f32.vlgmr.msra.gmra.mrb[6].mxu0 %vm831_vm3, %v822_v31 }
 0x32e   :  { %1185 = vmatprep.mubr.f32.mxu0 %v2586_v45  ;;  %2472 = vmatpush1.bf16.msra.mxu0 %v2520_v11 }
 0x32f   :  { %2474 = vmatprep.subr.bf16.mxu0 %v2524_v13 }
 0x332   :  { %2476 = vmatpush1.bf16.msra.mxu0 %v2526_v15 }
 0x333   :  { %2486 = vmatprep.subr.bf16.mxu0 %v2530_v17 }
 0x400   :  { %v905_v35 = vpop.f32.mrb[6].mxu0 }
 0x401   :  { %v909_v36 = vsel %vm571_vm1, %v905_v35, 0.0  ;;  %v917_v37 = vmul.f32 %v905_v35, %v905_v35  ;;  %v2305_v39 = vpop.f32.mrb[7].mxu0 }
 0x402   :  { %v910_v41 = vrot.slane %v909_v36, 4 }
 0x403   :  { %v918_v43 = vsel %vm571_vm1, %v917_v37, 0.0 }
 0x404   :  { %v911_v44 = vadd.f32 %v910_v41, %v909_v36  ;;  %v919_v46 = vrot.slane %v918_v43, 4 }
 0x406   :  { %v912_v47 = vrot.slane %v911_v44, 2  ;;  %v920_v48 = vadd.f32 %v919_v46, %v918_v43 }
 0x408   :  { %v913_v49 = vadd.f32 %v912_v47, %v911_v44  ;;  %v921_v50 = vrot.slane %v920_v48, 2  ;;  %v1052_v44 = vld [vmem:[%s3163_s13] sm:$0x1] }
 0x40a   :  { %v914_v51 = vrot.slane %v913_v49, 1  ;;  %v922_v52 = vadd.f32 %v921_v50, %v920_v48  ;;  %v1056_v48 = vld [vmem:[%s3164_s14] sm:$0x1] }
 0x40c   :  { %v915_v53 = vadd.f32 %v914_v51, %v913_v49  ;;  %v923_v54 = vrot.slane %v922_v52, 1 }
 0x40e   :  { %v916_v55 = vmul.f32 0.125, %v915_v53  ;;  %v924_v56 = vadd.f32 %v923_v54, %v922_v52 }
 0x410   :  { %v925_v57 = vmul.f32 0.125, %v924_v56  ;;  %v926_v58 = vmul.f32 %v916_v55, %v916_v55  ;;  %v2533_v56 = vld [vmem:[%s3165_s15 + $0x18] ss:$28 sps:$4 sm:$0xff]  }
 0x412   :  { %v927_v59 = vsub.f32 %v925_v57, %v926_v58  ;;  %v2534_v58 = vld [vmem:[%s3165_s15 + $0x4c] ss:$28 sps:$4 sm:$0xff]  }
 0x414   :  { %v928_v60 = vmax.f32 %v927_v59, 0.0  ;;  %v2536_v59 = vld [vmem:[%s3165_s15 + $0x48] ss:$28 sps:$4 sm:$0xff]  }
 0x416   :  { %v930_v61 = vadd.f32 1e-05, %v928_v60  ;;  %v2537_v60 = vld [vmem:[%s3165_s15 + $0x50] ss:$28 sps:$4 sm:$0xff]  }
 0x418   :  { %2542 = vrsqrt.f32 %v930_v61 }
 0x422   :  { %v2543_v63 = vpop.eup %2542 }
 0x423   :  { %v932_v0 = vmul.f32 %v2543_v63, %v929_v62  ;;  %v2587_v63 = vmov 1966171168  }
 0x425   :  { %v934_v2 = vmul.f32 %v932_v0, %v916_v55  ;;  %v940_v3 = vrot.slane %v932_v0, %v2905_v42  ;;  %v2532_v55 = vld [vmem:[%s3165_s15 + $0x10] ss:$28 sps:$4 sm:$0xff]   ;;  %v3031_v0 = vunpack.c.l.s4 %v2587_v63 }
 0x427   :  { %v935_v4 = vsub.f32 %v933_v1, %v934_v2  ;;  %v942_v5 = vmul.f32 %v940_v3, %v905_v35 }
 0x429   :  { %v947_v6 = vrot.slane %v935_v4, %v2905_v42 }
 0x42b   :  { %v949_v7 = vadd.f32 %v947_v6, %v942_v5 }
 0x42d   :  { %v950_v8 = vmax.f32 %v949_v7, 0.0 }
 0x42f   :  { %2315 = vmatmul.mubr.msk.f32.vlgmr.msra.gmra.mrb[6].mxu1 %vm571_vm1, %v950_v8 }
 0x430   :  { %1256 = vmatprep.mubr.f32.mxu1 %v2586_v45  ;;  %2480 = vmatpush1.bf16.msra.mxu1 %v2523_v12 }
 0x431   :  { %2482 = vmatprep.subr.bf16.mxu1 %v2527_v14 }
 0x434   :  { %2484 = vmatpush1.bf16.msra.mxu1 %v2529_v16 }
 0x435   :  { %2493 = vmatprep.subr.bf16.mxu1 %v2584_v38 }
 0x502   :  { %v1028_v18 = vpop.f32.mrb[6].mxu1 }
 0x503   :  { %v1032_v19 = vsel %vm571_vm1, %v1028_v18, 0.0  ;;  %v1040_v20 = vmul.f32 %v1028_v18, %v1028_v18  ;;  %v2316_v21 = vpop.f32.mrb[7].mxu1 }
 0x504   :  { %v1033_v22 = vrot.slane %v1032_v19, 4 }
 0x505   :  { %v1041_v23 = vsel %vm571_vm1, %v1040_v20, 0.0 }
 0x506   :  { %v1034_v24 = vadd.f32 %v1033_v22, %v1032_v19  ;;  %v1042_v25 = vrot.slane %v1041_v23, 4 }
 0x508   :  { %v1035_v26 = vrot.slane %v1034_v24, 2  ;;  %v1043_v27 = vadd.f32 %v1042_v25, %v1041_v23 }
 0x50a   :  { %v1036_v28 = vadd.f32 %v1035_v26, %v1034_v24  ;;  %v1044_v29 = vrot.slane %v1043_v27, 2 }
 0x50c   :  { %v1037_v30 = vrot.slane %v1036_v28, 1  ;;  %v1045_v31 = vadd.f32 %v1044_v29, %v1043_v27 }
 0x50e   :  { %v1038_v32 = vadd.f32 %v1037_v30, %v1036_v28  ;;  %v1046_v33 = vrot.slane %v1045_v31, 1 }
 0x510   :  { %v1039_v34 = vmul.f32 0.125, %v1038_v32  ;;  %v1047_v35 = vadd.f32 %v1046_v33, %v1045_v31 }
 0x512   :  { %v1048_v36 = vmul.f32 0.125, %v1047_v35  ;;  %v1049_v37 = vmul.f32 %v1039_v34, %v1039_v34 }
 0x514   :  { %v1050_v39 = vsub.f32 %v1048_v36, %v1049_v37 }
 0x516   :  { %v1051_v41 = vmax.f32 %v1050_v39, 0.0 }
 0x518   :  { %v1053_v43 = vadd.f32 1e-05, %v1051_v41 }
 0x51a   :  { %2544 = vrsqrt.f32 %v1053_v43 }
 0x524   :  { %v2545_v46 = vpop.eup %2544 }
 0x525   :  { %v1055_v47 = vmul.f32 %v2545_v46, %v1052_v44 }
 0x527   :  { %v1057_v49 = vmul.f32 %v1055_v47, %v1039_v34  ;;  %v1063_v50 = vrot.slane %v1055_v47, %v2905_v42 }
 0x529   :  { %v1058_v51 = vsub.f32 %v1056_v48, %v1057_v49  ;;  %v1065_v52 = vmul.f32 %v1063_v50, %v1028_v18 }
 0x52b   :  { %v1070_v53 = vrot.slane %v1058_v51, %v2905_v42 }
 0x52d   :  { %v1072_v54 = vadd.f32 %v1070_v53, %v1065_v52 }
 0x52f   :  { %v1073_v57 = vmax.f32 %v1072_v54, 0.0 }
 0x531   :  { %1780 = vmatmul.mubr.msk.f32.vlgmr.msra.gmra.mrb[8].mxu0 %vm571_vm1, %v1073_v57  ;;  %1781 = vmatmul.mubr.msk.f32.vlgmr.msra.gmra.mrb[8].mxu1 %vm571_vm1, %v1073_v57 }
 0x532   :  { %2488 = vmatpush1.bf16.msra.mxu0 %v2532_v55  ;;  %2495 = vmatpush3.bf16.msra.mxu1 %v2533_v56 }
 0x533   :  { %2490 = vmatprep.subr.bf16.mxu0 %v2534_v58  ;;  %2496 = vmatprep.subr.bf16.mxu1 %v2584_v38 }
 0x534   :  { %1327 = vmatprep.mubr.f32.mxu0 %v2586_v45  ;;  %2325 = vmatprep.mubr.msk.f32.mxu1 %vm2585_vm0, %v2586_v45 }
 0x536   :  { %2492 = vmatpush1.bf16.msra.mxu0 %v2536_v59  ;;  %2498 = vmatpush3.bf16.msra.mxu1 %v2537_v60 }
 0x539   :  { %1782 = vmatmul.mubr.msk.f32.vlgmr.msra.gmra.mrb[10].mxu0 %vm571_vm1, %v1073_v57  ;;  %2326 = vmatmul.mubr.msk.f32.vlgmr.msra.gmra.mrb[10].mxu1 %vm571_vm1, %v1073_v57 }
 0x604   :  { %v3027_v61 = vpop.f32.mrb[8].mxu0  ;;  %v3029_v62 = vpop.f32.mrb[8].mxu1 }
 0x605   :  { %v1404_v38 = vrot.slane %v3027_v61, 4  ;;  %v1453_v1 = vmul.f32 %v3027_v61, %v3027_v61  ;;  %v1416_v45 = vrot.slane %v3029_v62, 4  ;;  %v1455_v2 = vmul.f32 %v3029_v62, %v3029_v62  ;;  %v3039_v3 = vpop.f32.mrb[9].mxu0  ;;  %v3041_v4 = vpop.f32.mrb[9].mxu1 }
 0x606   :  { %v1410_v5 = vrot.slane %v3039_v3, 4  ;;  %v1454_v6 = vmul.f32 %v3039_v3, %v3039_v3  ;;  %v1422_v7 = vrot.slane %v3041_v4, 4  ;;  %v1456_v8 = vmul.f32 %v3041_v4, %v3041_v4 }
 0x607   :  { %v1405_v9 = vadd.f32 %v1404_v38, %v3027_v61  ;;  %v1460_v10 = vrot.slane %v1453_v1, 4  ;;  %v1417_v11 = vadd.f32 %v1416_v45, %v3029_v62  ;;  %v1472_v12 = vrot.slane %v1455_v2, 4 }
 0x608   :  { %v1411_v13 = vadd.f32 %v1410_v5, %v3039_v3  ;;  %v1466_v14 = vrot.slane %v1454_v6, 4  ;;  %v1423_v15 = vadd.f32 %v1422_v7, %v3041_v4  ;;  %v1478_v16 = vrot.slane %v1456_v8, 4 }
 0x609   :  { %v1406_v17 = vrot.slane %v1405_v9, 2  ;;  %v1461_v18 = vadd.f32 %v1460_v10, %v1453_v1  ;;  %v1418_v19 = vrot.slane %v1417_v11, 2  ;;  %v1473_v20 = vadd.f32 %v1472_v12, %v1455_v2 }
 0x60a   :  { %v1412_v21 = vrot.slane %v1411_v13, 2  ;;  %v1467_v22 = vadd.f32 %v1466_v14, %v1454_v6  ;;  %v1424_v23 = vrot.slane %v1423_v15, 2  ;;  %v1479_v24 = vadd.f32 %v1478_v16, %v1456_v8 }
 0x60b   :  { %v1407_v25 = vadd.f32 %v1406_v17, %v1405_v9  ;;  %v1462_v26 = vrot.slane %v1461_v18, 2  ;;  %v1419_v27 = vadd.f32 %v1418_v19, %v1417_v11  ;;  %v1474_v28 = vrot.slane %v1473_v20, 2 }
 0x60c   :  { %v1413_v29 = vadd.f32 %v1412_v21, %v1411_v13  ;;  %v1468_v30 = vrot.slane %v1467_v22, 2  ;;  %v1425_v31 = vadd.f32 %v1424_v23, %v1423_v15  ;;  %v1480_v32 = vrot.slane %v1479_v24, 2  ;;  %v3053_v33 = vpop.f32.mrb[10].mxu0  ;;  %v3055_v34 = vpop.f32.mrb[10].mxu1 }
 0x60d   :  { %v1408_v35 = vrot.slane %v1407_v25, 1  ;;  %v1463_v36 = vadd.f32 %v1462_v26, %v1461_v18  ;;  %v1420_v37 = vrot.slane %v1419_v27, 1  ;;  %v1475_v39 = vadd.f32 %v1474_v28, %v1473_v20  ;;  %v3057_v41 = vpop.f32.mrb[11].mxu0  ;;  %v2327_v43 = vpop.f32.mrb[11].mxu1 }
 0x60e   :  { %v1414_v44 = vrot.slane %v1413_v29, 1  ;;  %v1469_v46 = vadd.f32 %v1468_v30, %v1467_v22  ;;  %v1426_v47 = vrot.slane %v1425_v31, 1  ;;  %v1481_v48 = vadd.f32 %v1480_v32, %v1479_v24 }
 0x60f   :  { %v1409_v49 = vadd.f32 %v1408_v35, %v1407_v25  ;;  %v1464_v50 = vrot.slane %v1463_v36, 1  ;;  %v1421_v51 = vadd.f32 %v1420_v37, %v1419_v27  ;;  %v1476_v52 = vrot.slane %v1475_v39, 1 }
 0x610   :  { %v1415_v53 = vadd.f32 %v1414_v44, %v1413_v29  ;;  %v1470_v54 = vrot.slane %v1469_v46, 1  ;;  %v1427_v55 = vadd.f32 %v1426_v47, %v1425_v31  ;;  %v1482_v56 = vrot.slane %v1481_v48, 1 }
 0x611   :  { %v3059_v57 = vmul.f32 0.125, %v1409_v49  ;;  %v1465_v58 = vadd.f32 %v1464_v50, %v1463_v36  ;;  %v3061_v59 = vmul.f32 0.125, %v1421_v51  ;;  %v1477_v60 = vadd.f32 %v1476_v52, %v1475_v39 }
 0x612   :  { %v3063_v63 = vmul.f32 0.125, %v1415_v53  ;;  %v1471_v38 = vadd.f32 %v1470_v54, %v1469_v46  ;;  %v3065_v1 = vmul.f32 0.125, %v1427_v55  ;;  %v1483_v45 = vadd.f32 %v1482_v56, %v1481_v48 }
 0x613   :  { %v1502_v2 = vmul.f32 0.125, %v1465_v58  ;;  %v1509_v5 = vmul.f32 %v3059_v57, %v3059_v57  ;;  %v1504_v6 = vmul.f32 0.125, %v1477_v60  ;;  %v1511_v7 = vmul.f32 %v3061_v59, %v3061_v59 }
 0x614   :  { %v1503_v8 = vmul.f32 0.125, %v1471_v38  ;;  %v1510_v9 = vmul.f32 %v3063_v63, %v3063_v63  ;;  %v1505_v10 = vmul.f32 0.125, %v1483_v45  ;;  %v1512_v11 = vmul.f32 %v3065_v1, %v3065_v1 }
 0x615   :  { %v1516_v12 = vsub.f32 %v1502_v2, %v1509_v5  ;;  %v1518_v13 = vsub.f32 %v1504_v6, %v1511_v7  ;;  %v1428_v14 = vrot.slane %v3053_v33, 4  ;;  %v1457_v15 = vmul.f32 %v3053_v33, %v3053_v33 }
 0x616   :  { %v1517_v16 = vsub.f32 %v1503_v8, %v1510_v9  ;;  %v1519_v17 = vsub.f32 %v1505_v10, %v1512_v11  ;;  %v1440_v18 = vrot.slane %v3055_v34, 4  ;;  %v1459_v19 = vmul.f32 %v3055_v34, %v3055_v34 }
 0x617   :  { %v1523_v20 = vmax.f32 %v1516_v12, 0.0  ;;  %v1525_v21 = vmax.f32 %v1518_v13, 0.0  ;;  %v1429_v22 = vadd.f32 %v1428_v14, %v3053_v33  ;;  %v1484_v23 = vrot.slane %v1457_v15, 4 }
 0x618   :  { %v1524_v24 = vmax.f32 %v1517_v16, 0.0  ;;  %v1526_v25 = vmax.f32 %v1519_v17, 0.0  ;;  %v1441_v26 = vadd.f32 %v1440_v18, %v3055_v34  ;;  %v1496_v27 = vrot.slane %v1459_v19, 4 }
 0x619   :  { %v1531_v28 = vadd.f32 1e-05, %v1523_v20  ;;  %v1533_v29 = vadd.f32 1e-05, %v1525_v21  ;;  %v1430_v30 = vrot.slane %v1429_v22, 2  ;;  %v1485_v31 = vadd.f32 %v1484_v23, %v1457_v15 }
 0x61a   :  { %v1532_v32 = vadd.f32 1e-05, %v1524_v24  ;;  %v1534_v35 = vadd.f32 1e-05, %v1526_v25  ;;  %v1442_v36 = vrot.slane %v1441_v26, 2  ;;  %v1497_v37 = vadd.f32 %v1496_v27, %v1459_v19 }
 0x61b   :  { %2546 = vrsqrt.f32 %v1531_v28  ;;  %v1431_v39 = vadd.f32 %v1430_v30, %v1429_v22  ;;  %v1486_v43 = vrot.slane %v1485_v31, 2  ;;  %v1434_v44 = vrot.slane %v3057_v41, 4 }
 0x61c   :  { %2548 = vrsqrt.f32 %v1533_v29  ;;  %v1443_v46 = vadd.f32 %v1442_v36, %v1441_v26  ;;  %v1498_v47 = vrot.slane %v1497_v37, 2  ;;  %v1458_v48 = vmul.f32 %v3057_v41, %v3057_v41 }
 0x61d   :  { %2550 = vrsqrt.f32 %v1532_v32  ;;  %v1432_v49 = vrot.slane %v1431_v39, 1  ;;  %v1487_v50 = vadd.f32 %v1486_v43, %v1485_v31  ;;  %v1435_v51 = vadd.f32 %v1434_v44, %v3057_v41 }
 0x61e   :  { %2552 = vrsqrt.f32 %v1534_v35  ;;  %v1444_v52 = vrot.slane %v1443_v46, 1  ;;  %v1499_v53 = vadd.f32 %v1498_v47, %v1497_v37  ;;  %v1490_v54 = vrot.slane %v1458_v48, 4 }
 0x61f   :  { %v1433_v55 = vadd.f32 %v1432_v49, %v1431_v39  ;;  %v1488_v56 = vrot.slane %v1487_v50, 1  ;;  %v1436_v58 = vrot.slane %v1435_v51, 2  ;;  %v1557_v7 = vunpack.c.0.s8 %v3031_v0 }
 0x620   :  { %v1445_v60 = vadd.f32 %v1444_v52, %v1443_v46  ;;  %v1500_v38 = vrot.slane %v1499_v53, 1  ;;  %v1491_v45 = vadd.f32 %v1490_v54, %v1458_v48 }
 0x621   :  { %v3087_v2 = vmul.f32 0.125, %v1433_v55  ;;  %v1489_v5 = vadd.f32 %v1488_v56, %v1487_v50  ;;  %v1437_v6 = vadd.f32 %v1436_v58, %v1435_v51  ;;  %v3097_v0 = vsub.s32 %v1557_v7, %v2899_v40  ;;  %v1530_v58 = vld [vmem:[%s3166_s16] sm:$0xff] }
 0x622   :  { %v3090_v8 = vmul.f32 0.125, %v1445_v60  ;;  %v1501_v9 = vadd.f32 %v1500_v38, %v1499_v53  ;;  %v1492_v10 = vrot.slane %v1491_v45, 2  ;;  %v1610_v38 = vsub.s32 1, %v2899_v40 }
 0x623   :  { %v1506_v11 = vmul.f32 0.125, %v1489_v5  ;;  %v1513_v12 = vmul.f32 %v3087_v2, %v3087_v2  ;;  %v1438_v13 = vrot.slane %v1437_v6, 1  ;;  %v1618_v5 = vsub.s32 3, %v2899_v40 }
 0x624   :  { %v1508_v14 = vmul.f32 0.125, %v1501_v9  ;;  %v1515_v15 = vmul.f32 %v3090_v8, %v3090_v8  ;;  %v1493_v16 = vadd.f32 %v1492_v10, %v1491_v45  ;;  %v1614_v45 = vsub.s32 2, %v2899_v40 }
 0x625   :  { %v2547_v17 = vpop.eup %2546  ;;  %v1520_v18 = vsub.f32 %v1506_v11, %v1513_v12  ;;  %v1439_v19 = vadd.f32 %v1438_v13, %v1437_v6  ;;  %v1622_v6 = vsub.s32 4, %v2899_v40  ;;  %v1626_v7 = vsub.s32 5, %v2899_v40 }
 0x626   :  { %v2549_v20 = vpop.eup %2548  ;;  %v1522_v21 = vsub.f32 %v1508_v14, %v1515_v15  ;;  %v1494_v22 = vrot.slane %v1493_v16, 1  ;;  %v1630_v9 = vsub.s32 6, %v2899_v40 }
 0x627   :  { %v2551_v23 = vpop.eup %2550  ;;  %v1451_v24 = vmul.f32 0.125, %v1439_v19  ;;  %v1527_v27 = vmax.f32 %v1520_v18, 0.0 }
 0x628   :  { %v2553_v25 = vpop.eup %2552  ;;  %v1552_v26 = vcombine.low %v2547_v17, %v2551_v23  ;;  %v1495_v28 = vadd.f32 %v1494_v22, %v1493_v16  ;;  %v1529_v30 = vmax.f32 %v1522_v21, 0.0 }
 0x629   :  { %v1553_v29 = vcombine.low %v2549_v20, %v2553_v25  ;;  %v1514_v31 = vmul.f32 %v1451_v24, %v1451_v24  ;;  %v1535_v37 = vadd.f32 1e-05, %v1527_v27 }
 0x62a   :  { %v1561_v32 = vrot.slane %v1552_v26, %v3097_v0  ;;  %v1507_v35 = vmul.f32 0.125, %v1495_v28  ;;  %v1537_v44 = vadd.f32 1e-05, %v1529_v30 }
 0x62b   :  { %v1568_v36 = vrot.slane %v1553_v29, %v3097_v0  ;;  %2554 = vrsqrt.f32 %v1535_v37 }
 0x62c   :  { %v1521_v39 = vsub.f32 %v1507_v35, %v1514_v31  ;;  %2556 = vrsqrt.f32 %v1537_v44 }
 0x62d   :  { %v1583_v43 = vcombine.low %v1561_v32, %v1568_v36 }
 0x62e   :  { %v1528_v46 = vmax.f32 %v1521_v39, 0.0 }
 0x62f   :  { %v1591_v55 = vrot.slane %v1583_v43, %v3097_v0 }
 0x630   :  { %v1536_v47 = vadd.f32 1e-05, %v1528_v46 }
 0x632   :  { %2558 = vrsqrt.f32 %v1536_v47 }
 0x635   :  { %v2555_v48 = vpop.eup %2554 }
 0x636   :  { %v2557_v49 = vpop.eup %2556 }
 0x637   :  { %v1582_v52 = vrot.slane %v2557_v49, %v3097_v0 }
 0x63c   :  { %v2559_v50 = vpop.eup %2558 }
 0x63d   :  { %v1554_v51 = vcombine.low %v2555_v48, %v2559_v50 }
 0x63f   :  { %v1575_v53 = vrot.slane %v1554_v51, %v3097_v0 }
 0x641   :  { %v1584_v54 = vcombine.low %v1575_v53, %v1582_v52 }
 0x643   :  { %v1598_v56 = vrot.slane %v1584_v54, %v3097_v0 }
 0x645   :  { %v1599_v60 = vcombine.low %v1591_v55, %v1598_v56 }
 0x647   :  { %v1601_v10 = vmul.f32 %v1599_v60, %v1530_v58 }
 0x649   :  { %v1607_v11 = vrot.slane %v1601_v10, %v2905_v42  ;;  %v1611_v12 = vrot.slane %v1601_v10, %v1610_v38  ;;  %v1615_v13 = vrot.slane %v1601_v10, %v1614_v45  ;;  %v1619_v14 = vrot.slane %v1601_v10, %v1618_v5 }
 0x64a   :  { %v1623_v15 = vrot.slane %v1601_v10, %v1622_v6  ;;  %v1627_v16 = vrot.slane %v1601_v10, %v1626_v7  ;;  %v1631_v17 = vrot.slane %v1601_v10, %v1630_v9 }
 0x64b   :  { %v1639_v18 = vmul.f32 %v1607_v11, %v3059_v57  ;;  %v1640_v19 = vmul.f32 %v1611_v12, %v3063_v63  ;;  %v1641_v20 = vmul.f32 %v1615_v13, %v3061_v59  ;;  %v1642_v21 = vmul.f32 %v1619_v14, %v3065_v1 }
 0x64c   :  { %v1643_v22 = vmul.f32 %v1623_v15, %v3087_v2  ;;  %v1644_v40 = vmul.f32 %v1627_v16, %v1451_v24  ;;  %v1645_v23 = vmul.f32 %v1631_v17, %v3090_v8  ;;  %v1707_v25 = vmul.f32 %v1623_v15, %v3053_v33 }
 0x64d   :  { %v1653_v26 = vcombine.low %v1639_v18, %v1640_v19  ;;  %v1654_v27 = vcombine.low %v1641_v20, %v1642_v21  ;;  %v1708_v28 = vmul.f32 %v1627_v16, %v3057_v41  ;;  %v1709_v29 = vmul.f32 %v1631_v17, %v3055_v34 }
 0x64e   :  { %v1655_v57 = vcombine.low %v1643_v22, %v1644_v40  ;;  %v1703_v63 = vmul.f32 %v1607_v11, %v3027_v61  ;;  %v1704_v59 = vmul.f32 %v1611_v12, %v3039_v3  ;;  %v1705_v24 = vmul.f32 %v1615_v13, %v3029_v62  ;;  %v1602_v3 = vld [vmem:[%s3167_s17] sm:$0xff]  ;;  %s2560_s17 = scalar_lea.vmem %s1767_s1, 896 }
 0x64f   :  { %v1662_v1 = vrot.slane %v1653_v26, %v3097_v0  ;;  %v1669_v2 = vrot.slane %v1654_v27, %v3097_v0  ;;  %v1706_v8 = vmul.f32 %v1619_v14, %v3041_v4  ;;  %v1683_v30 = vrot.slane %v1645_v23, %v3097_v0  ;;  %p2561_p0 = scmp.ne.s32.totalorder %s1767_s1, %s2560_s17  ;;  %p2566_p2 = scmp.lt.s32.totalorder %s2560_s17, %s2560_s17 }
 0x650   :  { %v1676_v33 = vrot.slane %v1655_v57, %v3097_v0 }
 0x651   :  { %v1684_v41 = vcombine.low %v1662_v1, %v1669_v2  ;;  %p2567_p3 = por %p2566_p2, %p2565_p1 }
 0x652   :  { %v1685_v31 = vcombine.low %v1676_v33, %v1683_v30 }
 0x653   :  { %v1692_v34 = vrot.slane %v1684_v41, %v3097_v0  ;;  %p2568_p4 = pnand %p2567_p3, %p2561_p0 }
 0x654   :  { %v1699_v61 = vrot.slane %v1685_v31, %v3097_v0 }
 0x656   :  { %v1700_v32 = vcombine.low %v1692_v34, %v1699_v61 }
 0x658   :  { %v1702_v35 = vsub.f32 %v1602_v3, %v1700_v32 }
 0x65a   :  { %v1730_v36 = vrot.slane %v1702_v35, %v1622_v6  ;;  %v1734_v62 = vrot.slane %v1702_v35, %v1626_v7  ;;  %v1714_v4 = vrot.slane %v1702_v35, %v2905_v42  ;;  %v1718_v37 = vrot.slane %v1702_v35, %v1610_v38 }
 0x65b   :  { %v1722_v39 = vrot.slane %v1702_v35, %v1614_v45  ;;  %v1726_v43 = vrot.slane %v1702_v35, %v1618_v5  ;;  %v1738_v44 = vrot.slane %v1702_v35, %v1630_v9 }
 0x65c   :  { %v1750_v46 = vadd.f32 %v1730_v36, %v1707_v25  ;;  %v1751_v47 = vadd.f32 %v1734_v62, %v1708_v28  ;;  %v1746_v48 = vadd.f32 %v1714_v4, %v1703_v63  ;;  %v1747_v0 = vadd.f32 %v1718_v37, %v1704_v59 }
 0x65d   :  { %v1748_v49 = vadd.f32 %v1722_v39, %v1705_v24  ;;  %v1749_v50 = vadd.f32 %v1726_v43, %v1706_v8  ;;  %v1752_v51 = vadd.f32 %v1738_v44, %v1709_v29 }
 0x65e   :  { %1757 = vst [vmem:[#allocation2 + $0x20] sm:$0xff] %v1750_v46  ;;  %1758 = vst [vmem:[#allocation2 + $0x28] sm:$0xff] %v1751_v47 }
 0x65f   :  { %1753 = vst [vmem:[#allocation2] sm:$0xff] %v1746_v48  ;;  %1754 = vst [vmem:[#allocation2 + $0x8] sm:$0xff] %v1747_v0 }
 0x660   :  { %1755 = vst [vmem:[#allocation2 + $0x10] sm:$0xff] %v1748_v49  ;;  %1756 = vst [vmem:[#allocation2 + $0x18] sm:$0xff] %v1749_v50 }
 0x661   :  { %1759 = vst [vmem:[#allocation2 + $0x30] sm:$0xff] %v1752_v51 }
 0x662   :  { %2571 = shalt.err (!%p2568_p4)
}
 0x663   :  { %s2572_s21 = scalar_lea.hbm %s3168_s18, 896 }
 0x664   :  { %p2573_p5 = scmp.ne.s32.totalorder %s3168_s18, %s2572_s21  ;;  %p2576_p6 = scmp.lt.u32.totalorder %s2572_s21, %s3168_s18 }
 0x666   :  { %p2578_p7 = pnand %p2576_p6, %p2573_p5 }
 0x668   :  { %2581 = shalt.err (!%p2578_p7)
}
 0x669   :  { %1769 = dma.vmem_to_hbm [thread:$0]  %s1767_s1, 896, %s3168_s18, [#allocation3]  }
 0x66a   :  { %2582 = dma.done.wait [#allocation3], 896  }
 0x66b   :  { %2583 = vsyncadd [#allocation3], 4294966400 }
 0x66c   :  { %1773 = vsyncpa [#allocation3], 1 }

</bundles_post_ra>
